<compile_context>
chip_gen: v6e
topology: v6e:2x2x1
jax: 0.10.0
libtpu: 0.0.40
codegen_flags: <defaults>
</compile_context>

<pallas_src>
import math

import jax
import jax.numpy as jnp
from jax.experimental import pallas as pl
from jax.experimental.pallas import tpu as pltpu

_LANE = 128
_MAX_ROWS = 1024            # cap on gathered rows per grid step (loop-length bound)
_MAX_INFLIGHT = 32          # DMA semaphore ring size (row gathers in flight)
_MIN_ROW_BYTES = 512        # below this per-row payload, use the XLA fallback
_MAX_SMEM_IDX = 128 * 1024  # scalar-prefetch index-count guard (SMEM capacity)


def _round_up(x: int, m: int) -> int:
    return ((x + m - 1) // m) * m


def _vmem_budgets():
    """Per-step output-block budget + explicit scoped-VMEM limit, per generation."""
    try:
        cap = int(pltpu.get_tpu_info().vmem_capacity_bytes)
    except Exception:
        cap = 64 << 20                                   # conservative (v7x-sized)
    # ~8 MiB blocks on v5e/v6e (128 MiB VMEM), ~4 MiB on v7x (64 MiB VMEM);
    # output is double-buffered so the footprint is 2x this.
    block_budget = min(8 << 20, max(2 << 20, cap // 16))
    vmem_limit = max(32 << 20, min(cap // 2, 64 << 20))  # raise v5e's 16 MiB default
    return block_budget, vmem_limit


def _choose_post_tile(post: int, itemsize: int, row_slice_max: int) -> int:
    """Lane tile along the flattened trailing dims; 0 => no usable tile."""
    if post * itemsize <= row_slice_max:
        return post
    t = (row_slice_max // itemsize) // _LANE * _LANE
    while t >= _LANE:
        if post % t == 0:
            return t
        t -= _LANE
    return 0  # huge post with no 128-aligned divisor -> caller falls back


def _choose_rows(k: int, t_post: int, itemsize: int, block_budget: int):
    """Gathered rows per grid step: sublane-dense, block <= gather dim, ~budget-sized."""
    row_align = max(8, 32 // itemsize)        # 8 for f32, 16 for bf16, 32 for int8
    if k < row_align:
        return k, row_align                   # single block equal to the full dim
    row_bytes = max(1, t_post * itemsize)
    rows = block_budget // row_bytes          # amortize the ~0.35us/step overhead
    rows = max(row_align, min(rows, _MAX_ROWS))
    rows -= rows % row_align
    rows = min(rows, (k // row_align) * row_align)   # keep block <= array dim
    return max(rows, row_align), row_align


def _make_gather_kernel(rows: int, t_post: int, ring: int, lane_aligned: bool):
    def kernel(idx_ref, x_hbm, o_ref, sems):
        # idx_ref : SMEM (k_pad,) int32          (scalar prefetch)
        # x_hbm   : HBM  (pre, n, post) ref      (memory_space=pl.ANY, manual DMA)
        # o_ref   : VMEM (rows, t_post) out tile (leading pre dim squeezed)
        # sems    : (ring,) DMA semaphores       (row-gather ring)
        p = pl.program_id(0)          # flattened leading dims
        i = pl.program_id(1)          # row-block index along the gather axis
        j = pl.program_id(2)          # lane-tile index along flattened trailing dims
        base = i * rows
        col0 = j * t_post
        if lane_aligned:
            col0 = pl.multiple_of(col0, _LANE)

        def start(r, row):
            pltpu.make_async_copy(
                x_hbm.at[p, pl.ds(row, 1), pl.ds(col0, t_post)],
                o_ref.at[pl.ds(r, 1), :],           # land directly in the out block
                sems.at[r % ring],
            ).start()

        def wait(r):
            pltpu.make_async_copy(
                x_hbm.at[p, pl.ds(0, 1), pl.ds(col0, t_post)],
                o_ref.at[pl.ds(r, 1), :],
                sems.at[r % ring],
            ).wait()

        # Prologue: fill the DMA ring.  All SMEM index reads happen before any
        # .wait() (waits break SMEM sst->sld forwarding).
        n_pro = min(ring, rows)
        for r in range(n_pro):
            start(r, idx_ref[base + r])

        # Steady state: retire the copy whose semaphore slot is about to be
        # reused, then immediately issue the next gather -> `ring` row DMAs
        # stay in flight throughout the step.
        if rows > ring:
            @pl.loop(ring, rows)
            def _(r):
                row = idx_ref[base + r]     # scalar read before the wait
                wait(r - ring)
                start(r, row)

        # Epilogue: retire what is still in flight.  Data is already in o_ref;
        # BlockSpec pipelining writes this block back to HBM while the next
        # grid step's gathers are being issued (cross-step overlap).
        for r in range(rows - n_pro, rows):
            wait(r)

    return kernel


def _gather_rows(x3: jax.Array, idx: jax.Array, out_rows: int, *,
                 rows: int, t_post: int, ring: int, vmem_limit: int) -> jax.Array:
    """x3: [pre, N, post]; idx: [k_pad] int32 -> [pre, out_rows, post] = x3[:, idx[:out_rows], :]."""
    pre, _, post = x3.shape
    itemsize = x3.dtype.itemsize
    num_row_blocks = pl.cdiv(out_rows, rows)
    num_lane_blocks = post // t_post
    lane_aligned = (t_post % _LANE == 0)

    kernel = _make_gather_kernel(rows, t_post, ring, lane_aligned)

    grid_spec = pltpu.PrefetchScalarGridSpec(
        num_scalar_prefetch=1,
        grid=(pre, num_row_blocks, num_lane_blocks),
        in_specs=[pl.BlockSpec(memory_space=pl.ANY)],   # raw HBM ref, manual DMA
        out_specs=pl.BlockSpec(
            (None, rows, t_post),                       # pre dim squeezed
            lambda p, i, j, idx_ref: (p, i, j),
        ),
        scratch_shapes=[pltpu.SemaphoreType.DMA((ring,))],
    )

    cost = pl.CostEstimate(
        flops=0,
        transcendentals=0,
        bytes_accessed=2 * pre * out_rows * post * itemsize + 4 * idx.shape[0],
    )

    return pl.pallas_call(
        kernel,
        out_shape=jax.ShapeDtypeStruct((pre, out_rows, post), x3.dtype),
        grid_spec=grid_spec,
        compiler_params=pltpu.CompilerParams(
            dimension_semantics=("parallel", "parallel", "parallel"),
            vmem_limit_bytes=vmem_limit,
        ),
        cost_estimate=cost,
    )(idx, x3)


def onnx_gather(x: jax.Array, indices: jax.Array, axis: int = 0) -> jax.Array:
    """Exact semantics of OnnxGather.forward: x[(slice(None),)*axis + (indices,)]."""
    x = jnp.asarray(x)
    ndim = x.ndim
    axis = axis + ndim if axis < 0 else axis
    n = x.shape[axis]

    idx_shape = jnp.shape(indices)
    idx = jnp.asarray(indices, jnp.int32).reshape(-1)
    k = idx.shape[0]

    pre_shape = x.shape[:axis]
    post_shape = x.shape[axis + 1:]
    out_shape = pre_shape + idx_shape + post_shape

    if k == 0 or x.size == 0:
        return jnp.zeros(out_shape, x.dtype)

    # Negative-index fixup + clamp (OOB is undefined in ONNX; avoid OOB DMA).
    idx = jnp.where(idx < 0, idx + n, idx)
    idx = jnp.clip(idx, 0, n - 1)

    pre = math.prod(pre_shape) if pre_shape else 1
    post = math.prod(post_shape) if post_shape else 1

    # Metadata-only reshape: no transpose / HBM copy even for axis != 0.
    x3 = x.reshape(pre, n, post)
    itemsize = x.dtype.itemsize

    block_budget, vmem_limit = _vmem_budgets()
    t_post = _choose_post_tile(post, itemsize, block_budget // 8)

    use_pallas = (post * itemsize >= _MIN_ROW_BYTES) and (t_post > 0)
    if use_pallas:
        rows, row_align = _choose_rows(k, t_post, itemsize, block_budget)
        # Keep >= 2 row blocks when the rest of the grid is degenerate so the
        # grid can shard across v7x's two TensorCores.
        if pre * (post // t_post) == 1 and k > row_align:
            rows = min(rows, _round_up(pl.cdiv(k, 2), row_align))
        k_pad = _round_up(k, rows)          # pad only the SMEM index vector
        if k_pad > _MAX_SMEM_IDX:
            use_pallas = False              # index table would not fit SMEM

    if not use_pallas:
        # TODO(synk): dedicated Pallas paths for lane-sparse post (< 128 lanes /
        # post == 1), huge post with no 128-aligned divisor, and very large
        # index tables; fall back to XLA's gather for those shapes.
        out3 = jnp.take(x3, idx, axis=1)
        return out3.reshape(out_shape)

    if k_pad != k:
        idx = jnp.concatenate([idx, jnp.zeros((k_pad - k,), jnp.int32)])
    ring = min(rows, _MAX_INFLIGHT)

    # Output is exactly (pre, k, post): no post-kernel slice / extra HBM copy.
    out3 = _gather_rows(x3, idx, k, rows=rows, t_post=t_post, ring=ring,
                        vmem_limit=vmem_limit)
    return out3.reshape(out_shape)


if __name__ == "__main__":
    key = jax.random.PRNGKey(0)
    kx, k2, ki = jax.random.split(key, 3)

    # 1) Gather along the channel axis of an NCHW-like tensor with mixed
    #    (including negative) indices and a 2-D indices tensor.
    x = jax.random.normal(kx, (2, 4, 16, 16), dtype=jnp.float32)
    indices = jnp.array([[0, 3, -1], [2, 1, 0]], dtype=jnp.int32)
    out = jax.block_until_ready(onnx_gather(x, indices, axis=1))
    ref = jnp.take(x, jnp.where(indices < 0, indices + x.shape[1], indices), axis=1)
    assert out.shape == ref.shape and out.dtype == ref.dtype
    assert bool(jnp.all(out == ref))

    # 2) axis=0 with 1-D indices.
    idx0 = jnp.array([1, 0, 1], dtype=jnp.int32)
    out0 = jax.block_until_ready(onnx_gather(x, idx0, axis=0))
    ref0 = jnp.take(x, idx0, axis=0)
    assert out0.shape == ref0.shape and bool(jnp.all(out0 == ref0))

    # 3) 0-d indices tensor (axis gets squeezed, like torch fancy indexing).
    outs = jax.block_until_ready(onnx_gather(x, jnp.array(2, dtype=jnp.int32), axis=1))
    refs = jnp.take(x, jnp.array(2, dtype=jnp.int32), axis=1)
    assert outs.shape == refs.shape and bool(jnp.all(outs == refs))

    # 4) Larger index set: exercises the in-kernel DMA ring (rows > in-flight
    #    cap), the ragged last row-block, and the 2-row-block grid split.
    x2 = jax.random.normal(k2, (32, 16, 16), dtype=jnp.float32)
    idx2 = jax.random.randint(ki, (200,), 0, 32, dtype=jnp.int32)
    out2 = jax.block_until_ready(onnx_gather(x2, idx2, axis=0))
    ref2 = jnp.take(x2, idx2, axis=0)
    assert out2.shape == ref2.shape and bool(jnp.all(out2 == ref2))

    print("KERNEL_OK")
</pallas_src>

<mosaic_0001>
module attributes {stable_mosaic.version = 11 : i64} {
  func.func @kernel(%arg0: i32, %arg1: i32, %arg2: i32, %arg3: memref<6xi32, #tpu.memory_space<smem>>, %arg4: memref<2x4x256xf32, #tpu.memory_space<any>>, %arg5: memref<1x6x256xf32, #tpu.memory_space<vmem>>, %arg6: memref<6x!tpu.dma_semaphore, #tpu.memory_space<semaphore_mem>>) attributes {dimension_semantics = [#tpu.dimension_semantics<parallel>, #tpu.dimension_semantics<parallel>, #tpu.dimension_semantics<parallel>], iteration_bounds = array<i64: 2, 1, 1>, scalar_prefetch = 1 : i64, scratch_operands = 1 : i64, tpu.core_type = #tpu.core_type<tc>, window_params = [{}, {transform_indices = @transform_1, window_bounds = array<i64: 1, 6, 256>}]} {
    %c6_i32 = arith.constant 6 : i32
    %0 = arith.muli %arg1, %c6_i32 : i32
    %c256_i32 = arith.constant 256 : i32
    %1 = arith.muli %arg2, %c256_i32 : i32
    %2 = tpu.assume_multiple %1, 128 : i32
    %c0_i32 = arith.constant 0 : i32
    %3 = arith.addi %0, %c0_i32 : i32
    %4 = arith.index_cast %3 : i32 to index
    %5 = memref.load %arg3[%4] : memref<6xi32, #tpu.memory_space<smem>>
    %c0_i32_0 = arith.constant 0 : i32
    %6 = tpu.memref_slice %arg4[%arg0, %5, %2] : memref<2x4x256xf32, #tpu.memory_space<any>> -> memref<1x1x256xf32, #tpu.memory_space<any>>
    %7 = tpu.memref_squeeze %6 : memref<1x1x256xf32, #tpu.memory_space<any>> -> memref<1x256xf32, #tpu.memory_space<any>>
    %c0_i32_1 = arith.constant 0 : i32
    %c0_i32_2 = arith.constant 0 : i32
    %c0_i32_3 = arith.constant 0 : i32
    %8 = tpu.memref_slice %arg5[%c0_i32_1, %c0_i32_2, %c0_i32_3] : memref<1x6x256xf32, #tpu.memory_space<vmem>> -> memref<1x1x256xf32, #tpu.memory_space<vmem>>
    %9 = tpu.memref_squeeze %8 : memref<1x1x256xf32, #tpu.memory_space<vmem>> -> memref<1x256xf32, #tpu.memory_space<vmem>>
    %10 = tpu.memref_slice %arg6[%c0_i32_0] : memref<6x!tpu.dma_semaphore, #tpu.memory_space<semaphore_mem>> -> memref<1x!tpu.dma_semaphore, #tpu.memory_space<semaphore_mem>>
    %11 = tpu.memref_squeeze %10 : memref<1x!tpu.dma_semaphore, #tpu.memory_space<semaphore_mem>> -> memref<!tpu.dma_semaphore, #tpu.memory_space<semaphore_mem>>
    tpu.enqueue_dma source(%7 : memref<1x256xf32, #tpu.memory_space<any>>) target(%9 : memref<1x256xf32, #tpu.memory_space<vmem>>) target_semaphore(%11 : memref<!tpu.dma_semaphore, #tpu.memory_space<semaphore_mem>>)
    %c1_i32 = arith.constant 1 : i32
    %12 = arith.addi %0, %c1_i32 : i32
    %13 = arith.index_cast %12 : i32 to index
    %14 = memref.load %arg3[%13] : memref<6xi32, #tpu.memory_space<smem>>
    %c1_i32_4 = arith.constant 1 : i32
    %15 = tpu.memref_slice %arg4[%arg0, %14, %2] : memref<2x4x256xf32, #tpu.memory_space<any>> -> memref<1x1x256xf32, #tpu.memory_space<any>>
    %16 = tpu.memref_squeeze %15 : memref<1x1x256xf32, #tpu.memory_space<any>> -> memref<1x256xf32, #tpu.memory_space<any>>
    %c0_i32_5 = arith.constant 0 : i32
    %c1_i32_6 = arith.constant 1 : i32
    %c0_i32_7 = arith.constant 0 : i32
    %17 = tpu.memref_slice %arg5[%c0_i32_5, %c1_i32_6, %c0_i32_7] : memref<1x6x256xf32, #tpu.memory_space<vmem>> -> memref<1x1x256xf32, #tpu.memory_space<vmem>>
    %18 = tpu.memref_squeeze %17 : memref<1x1x256xf32, #tpu.memory_space<vmem>> -> memref<1x256xf32, #tpu.memory_space<vmem>>
    %19 = tpu.memref_slice %arg6[%c1_i32_4] : memref<6x!tpu.dma_semaphore, #tpu.memory_space<semaphore_mem>> -> memref<1x!tpu.dma_semaphore, #tpu.memory_space<semaphore_mem>>
    %20 = tpu.memref_squeeze %19 : memref<1x!tpu.dma_semaphore, #tpu.memory_space<semaphore_mem>> -> memref<!tpu.dma_semaphore, #tpu.memory_space<semaphore_mem>>
    tpu.enqueue_dma source(%16 : memref<1x256xf32, #tpu.memory_space<any>>) target(%18 : memref<1x256xf32, #tpu.memory_space<vmem>>) target_semaphore(%20 : memref<!tpu.dma_semaphore, #tpu.memory_space<semaphore_mem>>)
    %c2_i32 = arith.constant 2 : i32
    %21 = arith.addi %0, %c2_i32 : i32
    %22 = arith.index_cast %21 : i32 to index
    %23 = memref.load %arg3[%22] : memref<6xi32, #tpu.memory_space<smem>>
    %c2_i32_8 = arith.constant 2 : i32
    %24 = tpu.memref_slice %arg4[%arg0, %23, %2] : memref<2x4x256xf32, #tpu.memory_space<any>> -> memref<1x1x256xf32, #tpu.memory_space<any>>
    %25 = tpu.memref_squeeze %24 : memref<1x1x256xf32, #tpu.memory_space<any>> -> memref<1x256xf32, #tpu.memory_space<any>>
    %c0_i32_9 = arith.constant 0 : i32
    %c2_i32_10 = arith.constant 2 : i32
    %c0_i32_11 = arith.constant 0 : i32
    %26 = tpu.memref_slice %arg5[%c0_i32_9, %c2_i32_10, %c0_i32_11] : memref<1x6x256xf32, #tpu.memory_space<vmem>> -> memref<1x1x256xf32, #tpu.memory_space<vmem>>
    %27 = tpu.memref_squeeze %26 : memref<1x1x256xf32, #tpu.memory_space<vmem>> -> memref<1x256xf32, #tpu.memory_space<vmem>>
    %28 = tpu.memref_slice %arg6[%c2_i32_8] : memref<6x!tpu.dma_semaphore, #tpu.memory_space<semaphore_mem>> -> memref<1x!tpu.dma_semaphore, #tpu.memory_space<semaphore_mem>>
    %29 = tpu.memref_squeeze %28 : memref<1x!tpu.dma_semaphore, #tpu.memory_space<semaphore_mem>> -> memref<!tpu.dma_semaphore, #tpu.memory_space<semaphore_mem>>
    tpu.enqueue_dma source(%25 : memref<1x256xf32, #tpu.memory_space<any>>) target(%27 : memref<1x256xf32, #tpu.memory_space<vmem>>) target_semaphore(%29 : memref<!tpu.dma_semaphore, #tpu.memory_space<semaphore_mem>>)
    %c3_i32 = arith.constant 3 : i32
    %30 = arith.addi %0, %c3_i32 : i32
    %31 = arith.index_cast %30 : i32 to index
    %32 = memref.load %arg3[%31] : memref<6xi32, #tpu.memory_space<smem>>
    %c3_i32_12 = arith.constant 3 : i32
    %33 = tpu.memref_slice %arg4[%arg0, %32, %2] : memref<2x4x256xf32, #tpu.memory_space<any>> -> memref<1x1x256xf32, #tpu.memory_space<any>>
    %34 = tpu.memref_squeeze %33 : memref<1x1x256xf32, #tpu.memory_space<any>> -> memref<1x256xf32, #tpu.memory_space<any>>
    %c0_i32_13 = arith.constant 0 : i32
    %c3_i32_14 = arith.constant 3 : i32
    %c0_i32_15 = arith.constant 0 : i32
    %35 = tpu.memref_slice %arg5[%c0_i32_13, %c3_i32_14, %c0_i32_15] : memref<1x6x256xf32, #tpu.memory_space<vmem>> -> memref<1x1x256xf32, #tpu.memory_space<vmem>>
    %36 = tpu.memref_squeeze %35 : memref<1x1x256xf32, #tpu.memory_space<vmem>> -> memref<1x256xf32, #tpu.memory_space<vmem>>
    %37 = tpu.memref_slice %arg6[%c3_i32_12] : memref<6x!tpu.dma_semaphore, #tpu.memory_space<semaphore_mem>> -> memref<1x!tpu.dma_semaphore, #tpu.memory_space<semaphore_mem>>
    %38 = tpu.memref_squeeze %37 : memref<1x!tpu.dma_semaphore, #tpu.memory_space<semaphore_mem>> -> memref<!tpu.dma_semaphore, #tpu.memory_space<semaphore_mem>>
    tpu.enqueue_dma source(%34 : memref<1x256xf32, #tpu.memory_space<any>>) target(%36 : memref<1x256xf32, #tpu.memory_space<vmem>>) target_semaphore(%38 : memref<!tpu.dma_semaphore, #tpu.memory_space<semaphore_mem>>)
    %c4_i32 = arith.constant 4 : i32
    %39 = arith.addi %0, %c4_i32 : i32
    %40 = arith.index_cast %39 : i32 to index
    %41 = memref.load %arg3[%40] : memref<6xi32, #tpu.memory_space<smem>>
    %c4_i32_16 = arith.constant 4 : i32
    %42 = tpu.memref_slice %arg4[%arg0, %41, %2] : memref<2x4x256xf32, #tpu.memory_space<any>> -> memref<1x1x256xf32, #tpu.memory_space<any>>
    %43 = tpu.memref_squeeze %42 : memref<1x1x256xf32, #tpu.memory_space<any>> -> memref<1x256xf32, #tpu.memory_space<any>>
    %c0_i32_17 = arith.constant 0 : i32
    %c4_i32_18 = arith.constant 4 : i32
    %c0_i32_19 = arith.constant 0 : i32
    %44 = tpu.memref_slice %arg5[%c0_i32_17, %c4_i32_18, %c0_i32_19] : memref<1x6x256xf32, #tpu.memory_space<vmem>> -> memref<1x1x256xf32, #tpu.memory_space<vmem>>
    %45 = tpu.memref_squeeze %44 : memref<1x1x256xf32, #tpu.memory_space<vmem>> -> memref<1x256xf32, #tpu.memory_space<vmem>>
    %46 = tpu.memref_slice %arg6[%c4_i32_16] : memref<6x!tpu.dma_semaphore, #tpu.memory_space<semaphore_mem>> -> memref<1x!tpu.dma_semaphore, #tpu.memory_space<semaphore_mem>>
    %47 = tpu.memref_squeeze %46 : memref<1x!tpu.dma_semaphore, #tpu.memory_space<semaphore_mem>> -> memref<!tpu.dma_semaphore, #tpu.memory_space<semaphore_mem>>
    tpu.enqueue_dma source(%43 : memref<1x256xf32, #tpu.memory_space<any>>) target(%45 : memref<1x256xf32, #tpu.memory_space<vmem>>) target_semaphore(%47 : memref<!tpu.dma_semaphore, #tpu.memory_space<semaphore_mem>>)
    %c5_i32 = arith.constant 5 : i32
    %48 = arith.addi %0, %c5_i32 : i32
    %49 = arith.index_cast %48 : i32 to index
    %50 = memref.load %arg3[%49] : memref<6xi32, #tpu.memory_space<smem>>
    %c5_i32_20 = arith.constant 5 : i32
    %51 = tpu.memref_slice %arg4[%arg0, %50, %2] : memref<2x4x256xf32, #tpu.memory_space<any>> -> memref<1x1x256xf32, #tpu.memory_space<any>>
    %52 = tpu.memref_squeeze %51 : memref<1x1x256xf32, #tpu.memory_space<any>> -> memref<1x256xf32, #tpu.memory_space<any>>
    %c0_i32_21 = arith.constant 0 : i32
    %c5_i32_22 = arith.constant 5 : i32
    %c0_i32_23 = arith.constant 0 : i32
    %53 = tpu.memref_slice %arg5[%c0_i32_21, %c5_i32_22, %c0_i32_23] : memref<1x6x256xf32, #tpu.memory_space<vmem>> -> memref<1x1x256xf32, #tpu.memory_space<vmem>>
    %54 = tpu.memref_squeeze %53 : memref<1x1x256xf32, #tpu.memory_space<vmem>> -> memref<1x256xf32, #tpu.memory_space<vmem>>
    %55 = tpu.memref_slice %arg6[%c5_i32_20] : memref<6x!tpu.dma_semaphore, #tpu.memory_space<semaphore_mem>> -> memref<1x!tpu.dma_semaphore, #tpu.memory_space<semaphore_mem>>
    %56 = tpu.memref_squeeze %55 : memref<1x!tpu.dma_semaphore, #tpu.memory_space<semaphore_mem>> -> memref<!tpu.dma_semaphore, #tpu.memory_space<semaphore_mem>>
    tpu.enqueue_dma source(%52 : memref<1x256xf32, #tpu.memory_space<any>>) target(%54 : memref<1x256xf32, #tpu.memory_space<vmem>>) target_semaphore(%56 : memref<!tpu.dma_semaphore, #tpu.memory_space<semaphore_mem>>)
    %c0_i32_24 = arith.constant 0 : i32
    %c0_i32_25 = arith.constant 0 : i32
    %57 = tpu.memref_slice %arg4[%arg0, %c0_i32_25, %2] : memref<2x4x256xf32, #tpu.memory_space<any>> -> memref<1x1x256xf32, #tpu.memory_space<any>>
    %58 = tpu.memref_squeeze %57 : memref<1x1x256xf32, #tpu.memory_space<any>> -> memref<1x256xf32, #tpu.memory_space<any>>
    %c0_i32_26 = arith.constant 0 : i32
    %c0_i32_27 = arith.constant 0 : i32
    %c0_i32_28 = arith.constant 0 : i32
    %59 = tpu.memref_slice %arg5[%c0_i32_26, %c0_i32_27, %c0_i32_28] : memref<1x6x256xf32, #tpu.memory_space<vmem>> -> memref<1x1x256xf32, #tpu.memory_space<vmem>>
    %60 = tpu.memref_squeeze %59 : memref<1x1x256xf32, #tpu.memory_space<vmem>> -> memref<1x256xf32, #tpu.memory_space<vmem>>
    %61 = tpu.memref_slice %arg6[%c0_i32_24] : memref<6x!tpu.dma_semaphore, #tpu.memory_space<semaphore_mem>> -> memref<1x!tpu.dma_semaphore, #tpu.memory_space<semaphore_mem>>
    %62 = tpu.memref_squeeze %61 : memref<1x!tpu.dma_semaphore, #tpu.memory_space<semaphore_mem>> -> memref<!tpu.dma_semaphore, #tpu.memory_space<semaphore_mem>>
    tpu.wait_dma2 semaphore(%62 : memref<!tpu.dma_semaphore, #tpu.memory_space<semaphore_mem>>) src(%58 : memref<1x256xf32, #tpu.memory_space<any>>) dst(%60 : memref<1x256xf32, #tpu.memory_space<vmem>>)
    %c1_i32_29 = arith.constant 1 : i32
    %c0_i32_30 = arith.constant 0 : i32
    %63 = tpu.memref_slice %arg4[%arg0, %c0_i32_30, %2] : memref<2x4x256xf32, #tpu.memory_space<any>> -> memref<1x1x256xf32, #tpu.memory_space<any>>
    %64 = tpu.memref_squeeze %63 : memref<1x1x256xf32, #tpu.memory_space<any>> -> memref<1x256xf32, #tpu.memory_space<any>>
    %c0_i32_31 = arith.constant 0 : i32
    %c1_i32_32 = arith.constant 1 : i32
    %c0_i32_33 = arith.constant 0 : i32
    %65 = tpu.memref_slice %arg5[%c0_i32_31, %c1_i32_32, %c0_i32_33] : memref<1x6x256xf32, #tpu.memory_space<vmem>> -> memref<1x1x256xf32, #tpu.memory_space<vmem>>
    %66 = tpu.memref_squeeze %65 : memref<1x1x256xf32, #tpu.memory_space<vmem>> -> memref<1x256xf32, #tpu.memory_space<vmem>>
    %67 = tpu.memref_slice %arg6[%c1_i32_29] : memref<6x!tpu.dma_semaphore, #tpu.memory_space<semaphore_mem>> -> memref<1x!tpu.dma_semaphore, #tpu.memory_space<semaphore_mem>>
    %68 = tpu.memref_squeeze %67 : memref<1x!tpu.dma_semaphore, #tpu.memory_space<semaphore_mem>> -> memref<!tpu.dma_semaphore, #tpu.memory_space<semaphore_mem>>
    tpu.wait_dma2 semaphore(%68 : memref<!tpu.dma_semaphore, #tpu.memory_space<semaphore_mem>>) src(%64 : memref<1x256xf32, #tpu.memory_space<any>>) dst(%66 : memref<1x256xf32, #tpu.memory_space<vmem>>)
    %c2_i32_34 = arith.constant 2 : i32
    %c0_i32_35 = arith.constant 0 : i32
    %69 = tpu.memref_slice %arg4[%arg0, %c0_i32_35, %2] : memref<2x4x256xf32, #tpu.memory_space<any>> -> memref<1x1x256xf32, #tpu.memory_space<any>>
    %70 = tpu.memref_squeeze %69 : memref<1x1x256xf32, #tpu.memory_space<any>> -> memref<1x256xf32, #tpu.memory_space<any>>
    %c0_i32_36 = arith.constant 0 : i32
    %c2_i32_37 = arith.constant 2 : i32
    %c0_i32_38 = arith.constant 0 : i32
    %71 = tpu.memref_slice %arg5[%c0_i32_36, %c2_i32_37, %c0_i32_38] : memref<1x6x256xf32, #tpu.memory_space<vmem>> -> memref<1x1x256xf32, #tpu.memory_space<vmem>>
    %72 = tpu.memref_squeeze %71 : memref<1x1x256xf32, #tpu.memory_space<vmem>> -> memref<1x256xf32, #tpu.memory_space<vmem>>
    %73 = tpu.memref_slice %arg6[%c2_i32_34] : memref<6x!tpu.dma_semaphore, #tpu.memory_space<semaphore_mem>> -> memref<1x!tpu.dma_semaphore, #tpu.memory_space<semaphore_mem>>
    %74 = tpu.memref_squeeze %73 : memref<1x!tpu.dma_semaphore, #tpu.memory_space<semaphore_mem>> -> memref<!tpu.dma_semaphore, #tpu.memory_space<semaphore_mem>>
    tpu.wait_dma2 semaphore(%74 : memref<!tpu.dma_semaphore, #tpu.memory_space<semaphore_mem>>) src(%70 : memref<1x256xf32, #tpu.memory_space<any>>) dst(%72 : memref<1x256xf32, #tpu.memory_space<vmem>>)
    %c3_i32_39 = arith.constant 3 : i32
    %c0_i32_40 = arith.constant 0 : i32
    %75 = tpu.memref_slice %arg4[%arg0, %c0_i32_40, %2] : memref<2x4x256xf32, #tpu.memory_space<any>> -> memref<1x1x256xf32, #tpu.memory_space<any>>
    %76 = tpu.memref_squeeze %75 : memref<1x1x256xf32, #tpu.memory_space<any>> -> memref<1x256xf32, #tpu.memory_space<any>>
    %c0_i32_41 = arith.constant 0 : i32
    %c3_i32_42 = arith.constant 3 : i32
    %c0_i32_43 = arith.constant 0 : i32
    %77 = tpu.memref_slice %arg5[%c0_i32_41, %c3_i32_42, %c0_i32_43] : memref<1x6x256xf32, #tpu.memory_space<vmem>> -> memref<1x1x256xf32, #tpu.memory_space<vmem>>
    %78 = tpu.memref_squeeze %77 : memref<1x1x256xf32, #tpu.memory_space<vmem>> -> memref<1x256xf32, #tpu.memory_space<vmem>>
    %79 = tpu.memref_slice %arg6[%c3_i32_39] : memref<6x!tpu.dma_semaphore, #tpu.memory_space<semaphore_mem>> -> memref<1x!tpu.dma_semaphore, #tpu.memory_space<semaphore_mem>>
    %80 = tpu.memref_squeeze %79 : memref<1x!tpu.dma_semaphore, #tpu.memory_space<semaphore_mem>> -> memref<!tpu.dma_semaphore, #tpu.memory_space<semaphore_mem>>
    tpu.wait_dma2 semaphore(%80 : memref<!tpu.dma_semaphore, #tpu.memory_space<semaphore_mem>>) src(%76 : memref<1x256xf32, #tpu.memory_space<any>>) dst(%78 : memref<1x256xf32, #tpu.memory_space<vmem>>)
    %c4_i32_44 = arith.constant 4 : i32
    %c0_i32_45 = arith.constant 0 : i32
    %81 = tpu.memref_slice %arg4[%arg0, %c0_i32_45, %2] : memref<2x4x256xf32, #tpu.memory_space<any>> -> memref<1x1x256xf32, #tpu.memory_space<any>>
    %82 = tpu.memref_squeeze %81 : memref<1x1x256xf32, #tpu.memory_space<any>> -> memref<1x256xf32, #tpu.memory_space<any>>
    %c0_i32_46 = arith.constant 0 : i32
    %c4_i32_47 = arith.constant 4 : i32
    %c0_i32_48 = arith.constant 0 : i32
    %83 = tpu.memref_slice %arg5[%c0_i32_46, %c4_i32_47, %c0_i32_48] : memref<1x6x256xf32, #tpu.memory_space<vmem>> -> memref<1x1x256xf32, #tpu.memory_space<vmem>>
    %84 = tpu.memref_squeeze %83 : memref<1x1x256xf32, #tpu.memory_space<vmem>> -> memref<1x256xf32, #tpu.memory_space<vmem>>
    %85 = tpu.memref_slice %arg6[%c4_i32_44] : memref<6x!tpu.dma_semaphore, #tpu.memory_space<semaphore_mem>> -> memref<1x!tpu.dma_semaphore, #tpu.memory_space<semaphore_mem>>
    %86 = tpu.memref_squeeze %85 : memref<1x!tpu.dma_semaphore, #tpu.memory_space<semaphore_mem>> -> memref<!tpu.dma_semaphore, #tpu.memory_space<semaphore_mem>>
    tpu.wait_dma2 semaphore(%86 : memref<!tpu.dma_semaphore, #tpu.memory_space<semaphore_mem>>) src(%82 : memref<1x256xf32, #tpu.memory_space<any>>) dst(%84 : memref<1x256xf32, #tpu.memory_space<vmem>>)
    %c5_i32_49 = arith.constant 5 : i32
    %c0_i32_50 = arith.constant 0 : i32
    %87 = tpu.memref_slice %arg4[%arg0, %c0_i32_50, %2] : memref<2x4x256xf32, #tpu.memory_space<any>> -> memref<1x1x256xf32, #tpu.memory_space<any>>
    %88 = tpu.memref_squeeze %87 : memref<1x1x256xf32, #tpu.memory_space<any>> -> memref<1x256xf32, #tpu.memory_space<any>>
    %c0_i32_51 = arith.constant 0 : i32
    %c5_i32_52 = arith.constant 5 : i32
    %c0_i32_53 = arith.constant 0 : i32
    %89 = tpu.memref_slice %arg5[%c0_i32_51, %c5_i32_52, %c0_i32_53] : memref<1x6x256xf32, #tpu.memory_space<vmem>> -> memref<1x1x256xf32, #tpu.memory_space<vmem>>
    %90 = tpu.memref_squeeze %89 : memref<1x1x256xf32, #tpu.memory_space<vmem>> -> memref<1x256xf32, #tpu.memory_space<vmem>>
    %91 = tpu.memref_slice %arg6[%c5_i32_49] : memref<6x!tpu.dma_semaphore, #tpu.memory_space<semaphore_mem>> -> memref<1x!tpu.dma_semaphore, #tpu.memory_space<semaphore_mem>>
    %92 = tpu.memref_squeeze %91 : memref<1x!tpu.dma_semaphore, #tpu.memory_space<semaphore_mem>> -> memref<!tpu.dma_semaphore, #tpu.memory_space<semaphore_mem>>
    tpu.wait_dma2 semaphore(%92 : memref<!tpu.dma_semaphore, #tpu.memory_space<semaphore_mem>>) src(%88 : memref<1x256xf32, #tpu.memory_space<any>>) dst(%90 : memref<1x256xf32, #tpu.memory_space<vmem>>)
    return
  }
  func.func @transform_1(%arg0: i32, %arg1: i32, %arg2: i32, %arg3: memref<6xi32, #tpu.memory_space<smem>>) -> (i32, i32, i32) {
    %c0_i32 = arith.constant 0 : i32
    return %arg0, %arg1, %arg2 : i32, i32, i32
  }
}

</mosaic_0001>

<bundles_post_ra>
// kernel: tpu_custom_call.1
= control target key start
LH: loop header
LB: loop body
LE: loop exit
PB: predicated region body
PF: predicated region fallthrough
CT: control target
= control target key end

     0   :  { %s646_s9 = smov [#allocation4]   ;;  %s902_s0 = inlined_call_operand.hbm [shape: s32[6], index: 0, kind: input, shape index: {}]   ;;  %s903_s1 = inlined_call_operand.hbm [shape: f32[2,4,256], index: 1, kind: input, shape index: {}]   ;;  %s904_s2 = inlined_call_operand.vmem [shape: f32[2,6,256], index: 2, kind: output, shape index: {}]  }
   0x1   :  { %8 = dma.hbm_to_smem %s902_s0, 16, %s646_s9, [#allocation3] }
   0x2   :  { %612 = dma.done.wait [#allocation3], 16 }
   0x3   :  { %613 = vsyncadd [#allocation3], 4294967280 }
   0x4   :  { %10 = sfence }
   0x5   :  { %s668_s12 = smov 0   ;;  %s670_s13 = smov 0  }
   0x6 LB: > { %s31_s14 = sadd.s32 1, %s640_s12  ;;  %p419_p1 = scmp.lt.s32.totalorder %s644_s13, 2  ;;  %s644_s13 = sphi %s670_s13, %s16_s13   ;;  %s640_s12 = sphi %s668_s12, %s906_s12  }
   0x7   : > { %p33_p0 = scmp.ge.s32.totalorder %s31_s14, 2  ;;  %p78_p2 = scmp.lt.s32.totalorder %s640_s12, 1 }
   0x8   : > { %s93_s0 = sld [smem:[#allocation4]]  ;;  %s679_s16 = sshll.u32 %s640_s12, 3 }
   0x9   : > { %s908_s14 = smov (%p33_p0, %s31_s14), 0  ;;  %s690_s27 = sld [smem:[#allocation4 + $0x1]] }
   0xa   : > { %s79_s15 = scalar_select %p78_p2, %s640_s12, 1 }
   0xb   : > { %s707_s9 = scalar_lea.hbm %s903_s1, 256 }
   0xc   : > { %s405_s17 = sshll.u32 %s79_s15, 4 }
   0xd   : > { %s684_s20 = scalar_lea.vmem %s904_s2, %s405_s17 }
   0xe   : > { %s94_s21 = sshrl.u32 %s93_s0, 2  ;;  %s95_s22 = sand.u32 3, %s93_s0  }
   0xf   : > { %s379_s23 = sshll.u32 %s94_s21, 3  ;;  %s107_s24 = sshll.u32 %s684_s20, 4  ;;  %s687_s24 = int_to_ptr.vmem [resolvable:$true] %s107_s24 }
  0x10   : > { %s97_s25 = sadd.s32 %s379_s23, %s95_s22  ;;  %s121_s29 = scalar_lea.vmem %s684_s20, 1 }
  0x11   : > { %s103_s26 = sadd.s32 %s679_s16, %s97_s25  ;;  %s698_s5 = sshll.u32 %s121_s29, 4  ;;  %s737_s5 = int_to_ptr.vmem [resolvable:$true] %s698_s5 }
  0x12   : > { %s381_s28 = sshll.u32 %s103_s26, 4 }
  0x13   : > { %s696_s4 = scalar_lea.hbm %s903_s1, %s381_s28 }
  0x14   : > { %s448_s6 = scalar_lea.hbm %s696_s4, 32  ;;  %p453_p6 = scmp.lt.s32.totalorder %s696_s4, %s903_s1 }
  0x15   : > { %p449_p3 = scmp.ne.s32.totalorder %s696_s4, %s448_s6  ;;  %p454_p7 = scmp.lt.s32.totalorder %s707_s9, %s448_s6 }
  0x17   : > { %p450_p4 = pnand %p449_p3, %p419_p1  ;;  %p455_p8 = por %p454_p7, %p453_p6 }
  0x19   : > { %p451_p5 = pneg %p450_p4 }
  0x1b   : > { %p456_p9 = pnand %p455_p8, %p451_p5 }
  0x1d   : > { %459 = shalt.err (!%p456_p9)  }
  0x1e   : > { %s460_s12 = scalar_lea.vmem %s687_s24, 32  ;;  %s464_s17 = sshll.u32 %s904_s2, 4  ;;  %s721_s17 = int_to_ptr.vmem [resolvable:$false] %s464_s17 }
  0x1f   : > { %p461_p10 = scmp.ne.s32.totalorder %s687_s24, %s460_s12  ;;  %s724_s18 = scalar_lea.vmem %s721_s17, 512 }
  0x20   : > { %p467_p13 = scmp.lt.s32.totalorder %s687_s24, %s721_s17  ;;  %p468_p0 = scmp.lt.s32.totalorder %s724_s18, %s460_s12 }
  0x21   : > { %p462_p11 = pnand %p461_p10, %p419_p1 }
  0x22   : > { %p469_p2 = por %p468_p0, %p467_p13 }
  0x23   : > { %p463_p12 = pneg %p462_p11 }
  0x25   : > { %p470_p3 = pnand %p469_p2, %p463_p12 }
  0x27   : > { %473 = shalt.err (!%p470_p3)  }
  0x28   : > { %s647_s19 = smov 64   ;;  %s648_s21 = smov 128  }
  0x29   : > { %s649_s22 = smov 1   ;;  %s739_s23 = sld [smem:[#allocation4 + $0x2]] }
  0x2a   : > { %407 = dma.hbm_to_vmem [thread:$0]  (%p419_p1), %s696_s4, 32, %s687_s24, [#allocation2], %s647_s19, %s648_s21, %s649_s22 }
  0x2b   : > { %s138_s25 = scalar_lea.vmem %s684_s20, 2  ;;  %s742_s26 = sld [smem:[#allocation4 + $0x3]] }
  0x2c   : > { %s113_s28 = sshrl.u32 %s690_s27, 2  ;;  %s114_s29 = sand.u32 3, %s690_s27  }
  0x2d   : > { %s383_s30 = sshll.u32 %s113_s28, 3  ;;  %s141_s3 = sshll.u32 %s138_s25, 4  ;;  %s746_s3 = int_to_ptr.vmem [resolvable:$true] %s141_s3 }
  0x2e   : > { %s116_s6 = sadd.s32 %s383_s30, %s114_s29 }
  0x2f   : > { %s118_s7 = sadd.s32 %s679_s16, %s116_s6  ;;  %s130_s8 = sshrl.u32 %s739_s23, 2 }
  0x30   : > { %s384_s4 = sshll.u32 %s118_s7, 4  ;;  %s131_s0 = sand.u32 3, %s739_s23  }
  0x31   : > { %s120_s12 = scalar_lea.hbm %s903_s1, %s384_s4 }
  0x32   : > { %s474_s15 = scalar_lea.hbm %s120_s12, 32  ;;  %p479_p7 = scmp.lt.s32.totalorder %s120_s12, %s903_s1 }
  0x33   : > { %p475_p4 = scmp.ne.s32.totalorder %s120_s12, %s474_s15  ;;  %p480_p8 = scmp.lt.s32.totalorder %s707_s9, %s474_s15 }
  0x35   : > { %p476_p5 = pnand %p475_p4, %p419_p1  ;;  %p481_p9 = por %p480_p8, %p479_p7 }
  0x37   : > { %p477_p6 = pneg %p476_p5 }
  0x39   : > { %p482_p10 = pnand %p481_p9, %p477_p6 }
  0x3b   : > { %485 = shalt.err (!%p482_p10)  }
  0x3c   : > { %s486_s23 = scalar_lea.vmem %s737_s5, 32  ;;  %p493_p0 = scmp.lt.s32.totalorder %s737_s5, %s721_s17 }
  0x3d   : > { %p487_p11 = scmp.ne.s32.totalorder %s737_s5, %s486_s23  ;;  %p494_p2 = scmp.lt.s32.totalorder %s724_s18, %s486_s23 }
  0x3f   : > { %p488_p12 = pnand %p487_p11, %p419_p1  ;;  %p495_p3 = por %p494_p2, %p493_p0 }
  0x41   : > { %p489_p13 = pneg %p488_p12 }
  0x43   : > { %p496_p4 = pnand %p495_p3, %p489_p13 }
  0x45   : > { %499 = shalt.err (!%p496_p4)  }
  0x46   : > { %408 = dma.hbm_to_vmem [thread:$0]  (%p419_p1), %s120_s12, 32, %s737_s5, [#allocation2 + $0x1], %s647_s19, %s648_s21, %s649_s22 }
  0x47   : > { %s386_s25 = sshll.u32 %s130_s8, 3  ;;  %s147_s29 = sshrl.u32 %s742_s26, 2 }
  0x48   : > { %s133_s30 = sadd.s32 %s386_s25, %s131_s0  ;;  %s148_s6 = sand.u32 3, %s742_s26  }
  0x49   : > { %s135_s7 = sadd.s32 %s679_s16, %s133_s30  ;;  %s389_s4 = sshll.u32 %s147_s29, 3 }
  0x4a   : > { %s387_s10 = sshll.u32 %s135_s7, 4  ;;  %s150_s11 = sadd.s32 %s389_s4, %s148_s6 }
  0x4b   : > { %s137_s28 = scalar_lea.hbm %s903_s1, %s387_s10  ;;  %s152_s23 = sadd.s32 %s679_s16, %s150_s11 }
  0x4c   : > { %s500_s24 = scalar_lea.hbm %s137_s28, 32  ;;  %p505_p8 = scmp.lt.s32.totalorder %s137_s28, %s903_s1 }
  0x4d   : > { %p501_p5 = scmp.ne.s32.totalorder %s137_s28, %s500_s24  ;;  %p506_p9 = scmp.lt.s32.totalorder %s707_s9, %s500_s24 }
  0x4f   : > { %p502_p6 = pnand %p501_p5, %p419_p1  ;;  %p507_p10 = por %p506_p9, %p505_p8 }
  0x51   : > { %p503_p7 = pneg %p502_p6 }
  0x53   : > { %p508_p11 = pnand %p507_p10, %p503_p7 }
  0x55   : > { %511 = shalt.err (!%p508_p11)  }
  0x56   : > { %s512_s26 = scalar_lea.vmem %s746_s3, 32  ;;  %p519_p2 = scmp.lt.s32.totalorder %s746_s3, %s721_s17 }
  0x57   : > { %p513_p12 = scmp.ne.s32.totalorder %s746_s3, %s512_s26  ;;  %p520_p3 = scmp.lt.s32.totalorder %s724_s18, %s512_s26 }
  0x59   : > { %p514_p13 = pnand %p513_p12, %p419_p1  ;;  %p521_p4 = por %p520_p3, %p519_p2 }
  0x5b   : > { %p515_p0 = pneg %p514_p13 }
  0x5d   : > { %p522_p5 = pnand %p521_p4, %p515_p0 }
  0x5f   : > { %525 = shalt.err (!%p522_p5)  }
  0x60   : > { %409 = dma.hbm_to_vmem [thread:$0]  (%p419_p1), %s137_s28, 32, %s746_s3, [#allocation2 + $0x2], %s647_s19, %s648_s21, %s649_s22 }
  0x61   : > { %s390_s24 = sshll.u32 %s152_s23, 4  ;;  %s905_s8 = scalar_lea.vmem %s684_s20, 3 }
  0x62   : > { %s158_s0 = sshll.u32 %s905_s8, 4  ;;  %s154_s30 = scalar_lea.hbm %s903_s1, %s390_s24  ;;  %s159_s0 = int_to_ptr.vmem [resolvable:$true] %s158_s0 }
  0x63   : > { %s526_s6 = scalar_lea.hbm %s154_s30, 32  ;;  %p531_p9 = scmp.lt.s32.totalorder %s154_s30, %s903_s1 }
  0x64   : > { %p527_p6 = scmp.ne.s32.totalorder %s154_s30, %s526_s6  ;;  %p532_p10 = scmp.lt.s32.totalorder %s707_s9, %s526_s6 }
  0x66   : > { %p528_p7 = pnand %p527_p6, %p419_p1  ;;  %p533_p11 = por %p532_p10, %p531_p9 }
  0x68   : > { %p529_p8 = pneg %p528_p7 }
  0x6a   : > { %p534_p12 = pnand %p533_p11, %p529_p8 }
  0x6c   : > { %537 = shalt.err (!%p534_p12)  }
  0x6d   : > { %s538_s3 = scalar_lea.vmem %s159_s0, 32  ;;  %p545_p3 = scmp.lt.s32.totalorder %s159_s0, %s721_s17 }
  0x6e   : > { %p539_p13 = scmp.ne.s32.totalorder %s159_s0, %s538_s3  ;;  %p546_p4 = scmp.lt.s32.totalorder %s724_s18, %s538_s3 }
  0x70   : > { %p540_p0 = pnand %p539_p13, %p419_p1  ;;  %p547_p5 = por %p546_p4, %p545_p3 }
  0x72   : > { %p541_p2 = pneg %p540_p0 }
  0x74   : > { %p548_p6 = pnand %p547_p5, %p541_p2 }
  0x76   : > { %551 = shalt.err (!%p548_p6)  }
  0x77   : > { %410 = dma.hbm_to_vmem [thread:$0]  (%p419_p1), %s154_s30, 32, %s159_s0, [#allocation2 + $0x3], %s647_s19, %s648_s21, %s649_s22 }
  0x78   : > { %s391_s10 = sld [smem:[#allocation4 + $0x4]]  ;;  %s172_s11 = scalar_lea.vmem %s684_s20, 4 }
  0x79   : > { %s394_s15 = sld [smem:[#allocation4 + $0x5]]  ;;  %s175_s27 = sshll.u32 %s172_s11, 4  ;;  %s822_s27 = int_to_ptr.vmem [resolvable:$true] %s175_s27 }
  0x7a   : > { %s189_s28 = scalar_lea.vmem %s684_s20, 5 }
  0x7b   : > { %s192_s23 = sshll.u32 %s189_s28, 4  ;;  %s824_s23 = int_to_ptr.vmem [resolvable:$true] %s192_s23 }
  0x7e   : > { %s164_s5 = sshrl.u32 %s391_s10, 2  ;;  %s165_s12 = sand.u32 3, %s391_s10  }
  0x7f   : > { %s392_s26 = sshll.u32 %s164_s5, 3  ;;  %s181_s24 = sshrl.u32 %s394_s15, 2 }
  0x80   : > { %s167_s8 = sadd.s32 %s392_s26, %s165_s12  ;;  %s182_s25 = sand.u32 3, %s394_s15  }
  0x81   : > { %s169_s0 = sadd.s32 %s679_s16, %s167_s8  ;;  %s395_s29 = sshll.u32 %s181_s24, 3 }
  0x82   : > { %s393_s30 = sshll.u32 %s169_s0, 4  ;;  %s184_s6 = sadd.s32 %s395_s29, %s182_s25 }
  0x83   : > { %s171_s20 = scalar_lea.hbm %s903_s1, %s393_s30  ;;  %s186_s3 = sadd.s32 %s679_s16, %s184_s6 }
  0x84   : > { %s552_s11 = scalar_lea.hbm %s171_s20, 32  ;;  %p557_p10 = scmp.lt.s32.totalorder %s171_s20, %s903_s1 }
  0x85   : > { %p553_p7 = scmp.ne.s32.totalorder %s171_s20, %s552_s11  ;;  %p558_p11 = scmp.lt.s32.totalorder %s707_s9, %s552_s11 }
  0x87   : > { %p554_p8 = pnand %p553_p7, %p419_p1  ;;  %p559_p12 = por %p558_p11, %p557_p10 }
  0x89   : > { %p555_p9 = pneg %p554_p8 }
  0x8b   : > { %p560_p13 = pnand %p559_p12, %p555_p9 }
  0x8d   : > { %563 = shalt.err (!%p560_p13)  }
  0x8e   : > { %s564_s16 = scalar_lea.vmem %s822_s27, 32  ;;  %p571_p4 = scmp.lt.s32.totalorder %s822_s27, %s721_s17 }
  0x8f   : > { %p565_p0 = scmp.ne.s32.totalorder %s822_s27, %s564_s16  ;;  %p572_p5 = scmp.lt.s32.totalorder %s724_s18, %s564_s16 }
  0x91   : > { %p566_p2 = pnand %p565_p0, %p419_p1  ;;  %p573_p6 = por %p572_p5, %p571_p4 }
  0x93   : > { %p567_p3 = pneg %p566_p2 }
  0x95   : > { %p574_p7 = pnand %p573_p6, %p567_p3 }
  0x97   : > { %577 = shalt.err (!%p574_p7)  }
  0x98   : > { %411 = dma.hbm_to_vmem [thread:$0]  (%p419_p1), %s171_s20, 32, %s822_s27, [#allocation2 + $0x4], %s647_s19, %s648_s21, %s649_s22 }
  0x99   : > { %s396_s15 = sshll.u32 %s186_s3, 4 }
  0x9a   : > { %s188_s26 = scalar_lea.hbm %s903_s1, %s396_s15 }
  0x9b   : > { %s578_s24 = scalar_lea.hbm %s188_s26, 32  ;;  %p583_p11 = scmp.lt.s32.totalorder %s188_s26, %s903_s1 }
  0x9c   : > { %p579_p8 = scmp.ne.s32.totalorder %s188_s26, %s578_s24  ;;  %p584_p12 = scmp.lt.s32.totalorder %s707_s9, %s578_s24 }
  0x9e   : > { %p580_p9 = pnand %p579_p8, %p419_p1  ;;  %p585_p13 = por %p584_p12, %p583_p11 }
  0xa0   : > { %p581_p10 = pneg %p580_p9 }
  0xa2   : > { %p586_p0 = pnand %p585_p13, %p581_p10 }
  0xa4   : > { %589 = shalt.err (!%p586_p0)  }
  0xa5   : > { %s590_s27 = scalar_lea.vmem %s824_s23, 32  ;;  %p597_p5 = scmp.lt.s32.totalorder %s824_s23, %s721_s17 }
  0xa6   : > { %p591_p2 = scmp.ne.s32.totalorder %s824_s23, %s590_s27  ;;  %p598_p6 = scmp.lt.s32.totalorder %s724_s18, %s590_s27 }
  0xa8   : > { %p592_p3 = pnand %p591_p2, %p419_p1  ;;  %p599_p7 = por %p598_p6, %p597_p5 }
  0xaa   : > { %p593_p4 = pneg %p592_p3 }
  0xac   : > { %p600_p8 = pnand %p599_p7, %p593_p4 }
  0xae   : > { %603 = shalt.err (!%p600_p8)  }
  0xaf   : > { %412 = dma.hbm_to_vmem [thread:$0]  (%p419_p1), %s188_s26, 32, %s824_s23, [#allocation2 + $0x5], %s647_s19, %s648_s21, %s649_s22 }
  0xb0   : > { %615 = dma.done.wait (%p419_p1), [#allocation2], 32 }
  0xb1   : > { %617 = vsyncadd (%p419_p1), [#allocation2], 4294967264 }
  0xb2   : > { %619 = dma.done.wait (%p419_p1), [#allocation2 + $0x1], 32 }
  0xb3   : > { %621 = vsyncadd (%p419_p1), [#allocation2 + $0x1], 4294967264 }
  0xb4   : > { %623 = dma.done.wait (%p419_p1), [#allocation2 + $0x2], 32 }
  0xb5   : > { %625 = vsyncadd (%p419_p1), [#allocation2 + $0x2], 4294967264 }
  0xb6   : > { %627 = dma.done.wait (%p419_p1), [#allocation2 + $0x3], 32 }
  0xb7   : > { %629 = vsyncadd (%p419_p1), [#allocation2 + $0x3], 4294967264 }
  0xb8   : > { %631 = dma.done.wait (%p419_p1), [#allocation2 + $0x4], 32 }
  0xb9   : > { %633 = vsyncadd (%p419_p1), [#allocation2 + $0x4], 4294967264 }
  0xba   : > { %635 = dma.done.wait (%p419_p1), [#allocation2 + $0x5], 32 }
  0xbb   : > { %637 = vsyncadd (%p419_p1), [#allocation2 + $0x5], 4294967264  ;;  %s16_s13 = sadd.s32 1, %s644_s13   ;;  %s906_s12 = smov %s908_s14 }
  0xbc   : > { %p13_p9 = scmp.ge.s32.totalorder %s16_s13, 3  }
  0xbe   :  { %15 = sbr.rel (!%p13_p9) target bundleno = 6 (0x6), region = 60 }
  0xc3   :  { %247 = vsyncmov [#allocation2] }
  0xc6   :  { %s248_s9 = vpop.sfrf %247 }
  0xc7   :  { %p399_p10 = scmp.ne.s32.totalorder %s248_s9, 0 }
  0xc9   :  { %252 = shalt.err (%p399_p10)  }
  0xca   :  { %254 = vsyncmov [#allocation2 + $0x1] }
  0xcd   :  { %s255_s17 = vpop.sfrf %254 }
  0xce   :  { %p400_p11 = scmp.ne.s32.totalorder %s255_s17, 0 }
  0xd0   :  { %259 = shalt.err (%p400_p11)  }
  0xd1   :  { %261 = vsyncmov [#allocation2 + $0x2] }
  0xd4   :  { %s262_s18 = vpop.sfrf %261 }
  0xd5   :  { %p401_p1 = scmp.ne.s32.totalorder %s262_s18, 0 }
  0xd7   :  { %266 = shalt.err (%p401_p1)  }
  0xd8   :  { %268 = vsyncmov [#allocation2 + $0x3] }
  0xdb   :  { %s269_s19 = vpop.sfrf %268 }
  0xdc   :  { %p402_p12 = scmp.ne.s32.totalorder %s269_s19, 0 }
  0xde   :  { %273 = shalt.err (%p402_p12)  }
  0xdf   :  { %275 = vsyncmov [#allocation2 + $0x4] }
  0xe2   :  { %s276_s14 = vpop.sfrf %275 }
  0xe3   :  { %p403_p13 = scmp.ne.s32.totalorder %s276_s14, 0 }
  0xe5   :  { %280 = shalt.err (%p403_p13)  }
  0xe6   :  { %282 = vsyncmov [#allocation2 + $0x5] }
  0xe9   :  { %s283_s1 = vpop.sfrf %282 }
  0xea   :  { %p404_p0 = scmp.ne.s32.totalorder %s283_s1, 0 }
  0xec   :  { %287 = shalt.err (%p404_p0)  }

</bundles_post_ra>
